<compile_context>
chip_gen: v7x
topology: tpu7x:2x2x1
jax: 0.10.0
libtpu: 0.0.40
codegen_flags: <defaults>
</compile_context>

<pallas_src>
import functools

import jax
import jax.numpy as jnp
from jax import lax
from jax.experimental import pallas as pl
from jax.experimental.pallas import tpu as pltpu

_LANES = 128


def _round_up(x: int, m: int) -> int:
    return ((x + m - 1) // m) * m


def _triplet_loss_kernel(pos_ref, neg_ref, out_ref, acc_ref, *,
                         margin, batch, block_rows, blocks_per_core,
                         acc_rows, need_mask):
    c = pl.program_id(0)          # parallel axis (TensorCore split on v7x)
    i = pl.program_id(1)          # reduction axis (arbitrary)

    @pl.when(i == 0)
    def _init():
        acc_ref[...] = jnp.zeros_like(acc_ref)

    pos = pos_ref[...]            # (block_rows, 128), input dtype
    neg = neg_ref[...]

    # Hinge in the input dtype (bf16/f16 stay packed on v6e/v7x VALUs); the
    # accumulation below is always f32.
    # TODO(synk): v5e has no bf16 VALU — Mosaic upcasts automatically there,
    # so this path is merely neutral (not a win) on v5e.
    hinge = jnp.maximum(neg - pos + margin, 0.0).astype(jnp.float32)

    if need_mask:
        # Zero every element whose *global* index is >= batch.  This covers
        # (a) the pad-to-128 tail, (b) partial / garbage rows of the last
        # block, and (c) clamped duplicate blocks from an odd core split
        # (their unclamped block number puts them entirely past `batch`).
        blk = c * blocks_per_core + i
        base = blk * (block_rows * _LANES)
        row = lax.broadcasted_iota(jnp.int32, hinge.shape, 0)
        col = lax.broadcasted_iota(jnp.int32, hinge.shape, 1)
        valid = (base + row * _LANES + col) < batch
        hinge = jnp.where(valid, hinge, 0.0)

    # Fold the block onto (acc_rows, 128) independent f32 partials: pure
    # vreg-wise VPU adds, no cross-lane work in the steady state and no long
    # serial dependency chain into a single accumulator vreg.
    acc_ref[...] += hinge.reshape(-1, acc_rows, _LANES).sum(axis=0)

    @pl.when(i == pl.num_programs(1) - 1)
    def _finalize():
        # Collapse the partials to one (8, 128) slab per core; the cross-lane
        # reduce + 1/batch scale happen once in the wrapper.
        out_ref[...] = acc_ref[...].reshape(-1, 8, _LANES).sum(axis=0)


def fidelity_triplet_loss(fidelity_pos: jax.Array,
                          fidelity_neg: jax.Array,
                          margin: float = 0.2,
                          *,
                          target_block_bytes: int = 4 * 1024 * 1024,
                          num_parallel: int = 2) -> jax.Array:
    """Pallas TPU implementation of FidelityTripletLoss.forward.

    Args:
      fidelity_pos: (batch,) floating vector (f32 / bf16 / f16).
      fidelity_neg: (batch,) floating vector, same shape & dtype.
      margin: hinge margin (default 0.2, as in the nn.Module).
      target_block_bytes: per-input, per-pipeline-buffer block size target.
      num_parallel: leading grid axis size (2 drives both v7x TensorCores;
        harmless outer loop on 1-TC chips).

    Returns:
      scalar float32 loss.
    """
    assert fidelity_pos.shape == fidelity_neg.shape
    assert fidelity_pos.ndim == 1
    assert fidelity_pos.dtype == fidelity_neg.dtype
    batch = fidelity_pos.shape[0]
    dtype = fidelity_pos.dtype
    itemsize = jnp.dtype(dtype).itemsize
    sublane_tile = max(8, 32 // itemsize)        # 8 f32 / 16 bf16,f16 / 32 int8

    # ---- Layout: lane-dense (rows, 128) slab ------------------------------
    padded = _round_up(batch, _LANES)
    pad = padded - batch
    pos, neg = fidelity_pos, fidelity_neg
    if pad:
        # Only non-multiple-of-128 batches pay this copy; the values are
        # irrelevant (masked in-kernel), so plain zero-pad.
        pos = jnp.pad(pos, (0, pad))
        neg = jnp.pad(neg, (0, pad))
    rows = padded // _LANES
    pos2d = pos.reshape(rows, _LANES)            # free for contiguous 1-D
    neg2d = neg.reshape(rows, _LANES)

    # ---- Block sizing ------------------------------------------------------
    target_block_bytes = min(int(target_block_bytes), 6 * 1024 * 1024)
    max_block_rows = max(
        sublane_tile,
        (target_block_bytes // (_LANES * itemsize)) // sublane_tile * sublane_tile)
    if rows <= max_block_rows:
        block_rows = _round_up(rows, sublane_tile)
    else:
        block_rows = max_block_rows
    total_blocks = -(-rows // block_rows)

    num_parallel = max(1, min(int(num_parallel), total_blocks))
    blocks_per_core = -(-total_blocks // num_parallel)

    # Accumulator fold granularity: largest of {64,32,16,8} dividing block_rows.
    acc_rows = 8
    for cand in (64, 32, 16):
        if block_rows % cand == 0:
            acc_rows = cand
            break

    need_mask = (pad != 0
                 or total_blocks * block_rows != rows
                 or num_parallel * blocks_per_core != total_blocks)

    kernel = functools.partial(
        _triplet_loss_kernel,
        margin=float(margin), batch=batch, block_rows=block_rows,
        blocks_per_core=blocks_per_core, acc_rows=acc_rows,
        need_mask=need_mask)

    last_block = total_blocks - 1

    def in_map(c, i):
        # Clamp fully-OOB blocks (odd core split) back in range; their
        # contribution is masked to zero in the kernel via the unclamped index.
        return (jnp.minimum(c * blocks_per_core + i, last_block), 0)

    block_bytes = block_rows * _LANES * itemsize
    # 2 inputs x 2 pipeline buffers + headroom; within every generation's
    # physical VMEM, and above v5e's 16 MiB default scoped limit when needed.
    vmem_limit = int(2 * 2 * block_bytes + (8 << 20))

    partials = pl.pallas_call(
        kernel,
        out_shape=jax.ShapeDtypeStruct((num_parallel, 8, _LANES), jnp.float32),
        grid_spec=pltpu.PrefetchScalarGridSpec(
            num_scalar_prefetch=0,
            grid=(num_parallel, blocks_per_core),
            in_specs=[
                pl.BlockSpec((block_rows, _LANES), in_map),
                pl.BlockSpec((block_rows, _LANES), in_map),
            ],
            out_specs=pl.BlockSpec((None, 8, _LANES), lambda c, i: (c, 0, 0)),
            scratch_shapes=[pltpu.VMEM((acc_rows, _LANES), jnp.float32)],
        ),
        compiler_params=pltpu.CompilerParams(
            dimension_semantics=("parallel", "arbitrary"),
            vmem_limit_bytes=vmem_limit,
        ),
    )(pos2d, neg2d)

    # Tiny cross-partial reduce + mean scale (one small XLA op on (P, 8, 128)).
    return jnp.sum(partials) * (1.0 / float(batch))


def _reference(pos, neg, margin):
    # Matches torch semantics: hinge in the input dtype, mean accumulated f32.
    hinge = jnp.maximum(neg - pos + margin, 0.0)
    return jnp.mean(hinge.astype(jnp.float32))


if __name__ == "__main__":
    key = jax.random.PRNGKey(0)
    k1, k2, k3, k4, k5, k6, k7, k8 = jax.random.split(key, 8)

    # --- Test 1: module-default tiny batch, f32, single partial block -------
    b1 = 8
    p1 = jax.random.uniform(k1, (b1,), dtype=jnp.float32)
    n1 = jax.random.uniform(k2, (b1,), dtype=jnp.float32)
    out1 = jax.block_until_ready(fidelity_triplet_loss(p1, n1, margin=0.2))
    ref1 = _reference(p1, n1, 0.2)
    assert jnp.allclose(out1, ref1, atol=1e-6), (out1, ref1)

    # --- Test 2: ragged bf16 batch, tiny blocks -> 2-way split + masking ----
    b2 = 2500
    p2 = jax.random.uniform(k3, (b2,), dtype=jnp.float32).astype(jnp.bfloat16)
    n2 = jax.random.uniform(k4, (b2,), dtype=jnp.float32).astype(jnp.bfloat16)
    out2 = jax.block_until_ready(
        fidelity_triplet_loss(p2, n2, margin=0.3, target_block_bytes=4096))
    ref2 = _reference(p2, n2, 0.3)
    assert jnp.allclose(out2, ref2, atol=1e-5), (out2, ref2)

    # --- Test 3: multiple-of-128 f32, odd block count -> clamped dup block --
    b3 = 5120
    p3 = jax.random.uniform(k5, (b3,), dtype=jnp.float32)
    n3 = jax.random.uniform(k6, (b3,), dtype=jnp.float32)
    out3 = jax.block_until_ready(
        fidelity_triplet_loss(p3, n3, margin=0.2, target_block_bytes=4096))
    ref3 = _reference(p3, n3, 0.2)
    assert jnp.allclose(out3, ref3, atol=1e-5), (out3, ref3)

    # --- Test 4: multiple-of-128 f32, default blocks -> no pad, no mask -----
    b4 = 2048
    p4 = jax.random.uniform(k7, (b4,), dtype=jnp.float32)
    n4 = jax.random.uniform(k8, (b4,), dtype=jnp.float32)
    out4 = jax.block_until_ready(fidelity_triplet_loss(p4, n4, margin=0.2))
    ref4 = _reference(p4, n4, 0.2)
    assert jnp.allclose(out4, ref4, atol=1e-6), (out4, ref4)

    print("KERNEL_OK")
</pallas_src>

<mosaic_0001>
module attributes {stable_mosaic.version = 11 : i64} {
  func.func @_triplet_loss_kernel(%arg0: i32, %arg1: i32, %arg2: memref<8x128xf32, #tpu.memory_space<vmem>>, %arg3: memref<8x128xf32, #tpu.memory_space<vmem>>, %arg4: memref<1x8x128xf32, #tpu.memory_space<vmem>>, %arg5: memref<8x128xf32, #tpu.memory_space<vmem>>) attributes {dimension_semantics = [#tpu.dimension_semantics<parallel>, #tpu.dimension_semantics<arbitrary>], iteration_bounds = array<i64: 1, 1>, scalar_prefetch = 0 : i64, scratch_operands = 1 : i64, tpu.core_type = #tpu.core_type<tc>, window_params = [{transform_indices = @transform_0, window_bounds = array<i64: 8, 128>}, {transform_indices = @transform_1, window_bounds = array<i64: 8, 128>}, {transform_indices = @transform_2, window_bounds = array<i64: 1, 8, 128>}]} {
    %c0_i32 = arith.constant 0 : i32
    %0 = arith.cmpi eq, %arg1, %c0_i32 : i32
    %1 = arith.extui %0 : i1 to i32
    %c0_i32_0 = arith.constant 0 : i32
    %2 = arith.cmpi ne, %1, %c0_i32_0 : i32
    scf.if %2 {
      %cst_13 = arith.constant 0.000000e+00 : f32
      %32 = vector.broadcast %cst_13 : f32 to vector<8x128xf32>
      %c0_14 = arith.constant 0 : index
      %c0_15 = arith.constant 0 : index
      %33 = vector.load %arg5[%c0_14, %c0_15] : memref<8x128xf32, #tpu.memory_space<vmem>>, vector<8x128xf32>
      tpu.vector_store %arg5[%c0_14, %c0_15], %32 {strides = array<i32>} : memref<8x128xf32, #tpu.memory_space<vmem>>, vector<8x128xf32>,
    } else {
    }
    %c0 = arith.constant 0 : index
    %c0_1 = arith.constant 0 : index
    %3 = vector.load %arg2[%c0, %c0_1] : memref<8x128xf32, #tpu.memory_space<vmem>>, vector<8x128xf32>
    %c0_2 = arith.constant 0 : index
    %c0_3 = arith.constant 0 : index
    %4 = vector.load %arg3[%c0_2, %c0_3] : memref<8x128xf32, #tpu.memory_space<vmem>>, vector<8x128xf32>
    %5 = arith.subf %4, %3 : vector<8x128xf32>
    %cst = arith.constant 2.000000e-01 : f32
    %6 = vector.broadcast %cst : f32 to vector<8x128xf32>
    %7 = arith.addf %5, %6 : vector<8x128xf32>
    %cst_4 = arith.constant 0.000000e+00 : f32
    %8 = vector.broadcast %cst_4 : f32 to vector<8x128xf32>
    %9 = arith.maximumf %7, %8 : vector<8x128xf32>
    %c1_i32 = arith.constant 1 : i32
    %10 = arith.muli %arg0, %c1_i32 : i32
    %11 = arith.addi %10, %arg1 : i32
    %c1024_i32 = arith.constant 1024 : i32
    %12 = arith.muli %11, %c1024_i32 : i32
    %13 = tpu.iota {dimensions = array<i32: 0>} : vector<8x128xi32>
    %14 = tpu.iota {dimensions = array<i32: 1>} : vector<8x128xi32>
    %c128_i32 = arith.constant 128 : i32
    %15 = vector.broadcast %c128_i32 : i32 to vector<8x128xi32>
    %16 = arith.muli %13, %15 : vector<8x128xi32>
    %17 = vector.broadcast %12 : i32 to vector<8x128xi32>
    %18 = arith.addi %17, %16 : vector<8x128xi32>
    %19 = arith.addi %18, %14 : vector<8x128xi32>
    %c8_i32 = arith.constant 8 : i32
    %20 = vector.broadcast %c8_i32 : i32 to vector<8x128xi32>
    %21 = arith.cmpi slt, %19, %20 : vector<8x128xi32>
    %cst_5 = arith.constant 0.000000e+00 : f32
    %22 = vector.broadcast %cst_5 : f32 to vector<8x128xf32>
    %23 = arith.select %21, %9, %22 : vector<8x128xi1>, vector<8x128xf32>
    %c0_6 = arith.constant 0 : index
    %c0_7 = arith.constant 0 : index
    %24 = vector.load %arg5[%c0_6, %c0_7] : memref<8x128xf32, #tpu.memory_space<vmem>>, vector<8x128xf32>
    %25 = vector.shape_cast %23 : vector<8x128xf32> to vector<1x8x128xf32>
    %cst_8 = arith.constant dense<0.000000e+00> : vector<8x128xf32>
    %26 = vector.multi_reduction <add>, %25, %cst_8 [0] : vector<1x8x128xf32> to vector<8x128xf32>
    %27 = arith.addf %24, %26 : vector<8x128xf32>
    %c0_9 = arith.constant 0 : index
    %c0_10 = arith.constant 0 : index
    %28 = vector.load %arg5[%c0_9, %c0_10] : memref<8x128xf32, #tpu.memory_space<vmem>>, vector<8x128xf32>
    tpu.vector_store %arg5[%c0_9, %c0_10], %27 {strides = array<i32>} : memref<8x128xf32, #tpu.memory_space<vmem>>, vector<8x128xf32>,
    %c0_i32_11 = arith.constant 0 : i32
    %29 = arith.cmpi eq, %arg1, %c0_i32_11 : i32
    %30 = arith.extui %29 : i1 to i32
    %c0_i32_12 = arith.constant 0 : i32
    %31 = arith.cmpi ne, %30, %c0_i32_12 : i32
    scf.if %31 {
      %c0_13 = arith.constant 0 : index
      %c0_14 = arith.constant 0 : index
      %32 = vector.load %arg5[%c0_13, %c0_14] : memref<8x128xf32, #tpu.memory_space<vmem>>, vector<8x128xf32>
      %33 = vector.shape_cast %32 : vector<8x128xf32> to vector<1x8x128xf32>
      %cst_15 = arith.constant dense<0.000000e+00> : vector<8x128xf32>
      %34 = vector.multi_reduction <add>, %33, %cst_15 [0] : vector<1x8x128xf32> to vector<8x128xf32>
      %c0_16 = arith.constant 0 : index
      %c0_17 = arith.constant 0 : index
      %c0_18 = arith.constant 0 : index
      %35 = vector.load %arg4[%c0_16, %c0_17, %c0_18] : memref<1x8x128xf32, #tpu.memory_space<vmem>>, vector<1x8x128xf32>
      %36 = vector.shape_cast %35 : vector<1x8x128xf32> to vector<8x128xf32>
      %37 = vector.shape_cast %34 : vector<8x128xf32> to vector<1x8x128xf32>
      tpu.vector_store %arg4[%c0_16, %c0_17, %c0_18], %37 {strides = array<i32>} : memref<1x8x128xf32, #tpu.memory_space<vmem>>, vector<1x8x128xf32>,
    } else {
    }
    return
  }
  func.func @transform_0(%arg0: i32, %arg1: i32) -> (i32, i32) {
    %c1_i32 = arith.constant 1 : i32
    %0 = arith.muli %arg0, %c1_i32 : i32
    %1 = arith.addi %0, %arg1 : i32
    %c0_i32 = arith.constant 0 : i32
    %2 = arith.minsi %1, %c0_i32 : i32
    %c0_i32_0 = arith.constant 0 : i32
    %c0_i32_1 = arith.constant 0 : i32
    return %2, %c0_i32_0 : i32, i32
  }
  func.func @transform_1(%arg0: i32, %arg1: i32) -> (i32, i32) {
    %c1_i32 = arith.constant 1 : i32
    %0 = arith.muli %arg0, %c1_i32 : i32
    %1 = arith.addi %0, %arg1 : i32
    %c0_i32 = arith.constant 0 : i32
    %2 = arith.minsi %1, %c0_i32 : i32
    %c0_i32_0 = arith.constant 0 : i32
    %c0_i32_1 = arith.constant 0 : i32
    return %2, %c0_i32_0 : i32, i32
  }
  func.func @transform_2(%arg0: i32, %arg1: i32) -> (i32, i32, i32) {
    %c0_i32 = arith.constant 0 : i32
    %c0_i32_0 = arith.constant 0 : i32
    %c0_i32_1 = arith.constant 0 : i32
    return %arg0, %c0_i32, %c0_i32_0 : i32, i32, i32
  }
}

</mosaic_0001>

<bundles_post_ra>
// kernel: tpu_custom_call.1
= control target key start
LH: loop header
LB: loop body
LE: loop exit
PB: predicated region body
PF: predicated region fallthrough
CT: control target
= control target key end

     0   :  { %7 = vsyncpa [#allocation4], 0  ;;  %s230_s0 = inlined_call_operand.hbm [shape: f32[1,128], index: 0, kind: input, shape index: {}]   ;;  %s231_s1 = inlined_call_operand.vmem [shape: f32[1,128], index: 1, kind: input, shape index: {}]   ;;  %s232_s2 = inlined_call_operand.hbm [shape: f32[1,8,128], index: 2, kind: output, shape index: {}]  }
   0x1   :  { %8 = vsyncpa [#allocation5], 0 }
   0x2   :  { %19 = vsyncadd [#allocation4], 112  ;;  %s184_s9 = smov [#allocation3]   ;;  %s136_s13 = scalar_lea.hbm %s230_s0, 16 }
   0x3   :  { %s23_s10 = sshll.u32 %s184_s9, 4  ;;  %p137_p0 = scmp.ne.s32.totalorder %s230_s0, %s136_s13  ;;  %s24_s10 = int_to_ptr.vmem [resolvable:$true] %s23_s10 }
   0x4   :  { %p140_p1 = scmp.lt.u32.totalorder %s136_s13, %s230_s0 }
   0x6   :  { %p142_p2 = pnand %p140_p1, %p137_p0 }
   0x8   :  { %145 = shalt.err (!%p142_p2)
}
   0x9   :  { %s146_s18 = scalar_lea.vmem %s24_s10, 16  ;;  %s150_s19 = scalar_lea.vmem %s24_s10, 128 }
   0xa   :  { %p147_p3 = scmp.ne.s32.totalorder %s24_s10, %s146_s18  ;;  %p151_p4 = scmp.lt.s32.totalorder %s24_s10, %s24_s10 }
   0xb   :  { %p152_p5 = scmp.lt.s32.totalorder %s150_s19, %s146_s18 }
   0xd   :  { %p153_p6 = por %p152_p5, %p151_p4 }
   0xf   :  { %p154_p7 = pnand %p153_p6, %p147_p3 }
  0x11   :  { %157 = shalt.err (!%p154_p7)
}
  0x12   :  { %s185_s20 = smov 16   ;;  %s186_s21 = smov 1  }
  0x13   :  { %29 = dma.hbm_to_vmem [thread:$0]  %s230_s0, 16, %s24_s10, [#allocation4], %s185_s20, %s185_s20, %s186_s21  }
  0x14   :  { %180 = dma.done.wait [#allocation4], 128  }
  0x15   :  { %181 = vsyncadd [#allocation4], 4294967168  ;;  %v92_v0 = vlaneseq  ;;  %v85_v4 = vld [vmem:[#allocation3] sm:$0xff]  ;;  %s187_s26 = smov [#allocation6]  }
  0x16   :  { %v86_v5 = vld [vmem:[%s231_s1] sm:$0xff]  ;;  %s118_s27 = sshll.u32 %s187_s26, 4  ;;  %s119_s27 = int_to_ptr.vmem [resolvable:$true] %s118_s27 }
  0x17   :  { %v93_v1 = vshrl.u32 %v92_v0, 7  ;;  %v95_v2 = vand.u32 127, %v92_v0  ;;  %v87_v7 = vsub.f32 %v86_v5, %v85_v4  ;;  %s158_s0 = scalar_lea.vmem %s119_s27, 128  ;;  %p163_p9 = scmp.lt.s32.totalorder %s119_s27, %s119_s27 }
  0x18   :  { %p159_p8 = scmp.ne.s32.totalorder %s119_s27, %s158_s0  ;;  %p164_p10 = scmp.lt.s32.totalorder %s158_s0, %s158_s0 }
  0x19   :  { %v96_v3 = vmul.u32 128, %v93_v1  ;;  %v88_v8 = vadd.f32 0.2, %v87_v7 }
  0x1a   :  { %p165_p11 = por %p164_p10, %p163_p9 }
  0x1b   :  { %v99_v6 = vadd.s32 %v96_v3, %v95_v2  ;;  %v89_v9 = vmax.f32 %v88_v8, 0.0 }
  0x1c   :  { %p166_p12 = pnand %p165_p11, %p159_p8 }
  0x1d   :  { %vm100_vm0 = vcmp.lt.s32.totalorder %v99_v6, 8 }
  0x1e   :  { %v101_v10 = vsel %vm100_vm0, %v89_v9, 0.0 }
  0x1f   :  { %111 = vst [vmem:[#allocation6] sm:$0xff] %v101_v10 }
  0x20   :  { %169 = shalt.err (!%p166_p12)
}
  0x21   :  { %s170_s1 = scalar_lea.hbm %s232_s2, 128 }
  0x22   :  { %p171_p13 = scmp.ne.s32.totalorder %s232_s2, %s170_s1  ;;  %p174_p0 = scmp.lt.u32.totalorder %s170_s1, %s232_s2 }
  0x24   :  { %p176_p1 = pnand %p174_p0, %p171_p13 }
  0x26   :  { %179 = shalt.err (!%p176_p1)
}
  0x27   :  { %121 = dma.vmem_to_hbm [thread:$0]  %s119_s27, 128, %s232_s2, [#allocation5]  }
  0x28   :  { %182 = dma.done.wait [#allocation5], 128  }
  0x29   :  { %183 = vsyncadd [#allocation5], 4294967168 }
  0x2a   :  { %125 = vsyncpa [#allocation4], 1 }
  0x2b   :  { %126 = vsyncpa [#allocation5], 1 }

</bundles_post_ra>
